<compile_context>
chip_gen: v7x
topology: tpu7x:2x2x1
jax: 0.10.0
libtpu: 0.0.40
codegen_flags: <defaults>
</compile_context>

<pallas_src>
import jax
import jax.numpy as jnp
from jax import lax
from jax.experimental import pallas as pl
from jax.experimental.pallas import tpu as pltpu


def make_kernel(filter_sizes, filter_nums, TB, L, F_pad, compute_dtype):
    n_f = len(filter_sizes)
    Fn = filter_nums

    def kernel(maxlen_ref, enc_ref, mask_ref, wt_ref, bt_ref,
               wstack_ref, bstack_ref, out_ref):
        max_len = maxlen_ref[0]                       # scalar (SMEM): dynamic crop length

        # masked_fill(mask == 0, 0)  — mask is 0/1 so multiply is exact.
        x = enc_ref[...] * mask_ref[...]              # (TB, L, Hb) compute_dtype
        x2 = x.reshape(TB * L, x.shape[-1])           # fold batch into M

        # sentence_transform: Linear(bert_size -> cnn_size); Dropout == identity (eval).
        h = jnp.dot(x2, wt_ref[...],
                    preferred_element_type=jnp.float32) + bt_ref[...]
        h = h.astype(compute_dtype)

        # All Conv1d taps of all filter sizes as ONE wide matmul:
        # Z[:, off_i + j*Fn + f] = tap j of filter-bank i applied at each row.
        z = jnp.dot(h, wstack_ref[...],
                    preferred_element_type=jnp.float32)      # (TB*L, sum_k k*Fn) f32
        z3 = z.reshape(TB, L, z.shape[-1])

        b_all = bstack_ref[...]                       # (1, n_f*Fn) f32 conv biases
        # Hoisted position iota (sliced per filter size below).
        t_pos = lax.broadcasted_iota(jnp.int32, (1, L, 1), 1)

        pooled = []
        off = 0
        for i, k in enumerate(filter_sizes):
            L_out = L - k + 1
            # Conv1d(kernel=k) = sum of k time-shifted tap columns of Z.
            # TODO(synk): the time shift could also be expressed with
            # pltpu.roll (XLU) instead of static slices.
            acc = z3[:, 0:L_out, off:off + Fn]
            for j in range(1, k):
                acc = acc + z3[:, j:j + L_out,
                               off + j * Fn: off + (j + 1) * Fn]
            off += k * Fn
            acc = acc + b_all[:, i * Fn:(i + 1) * Fn]         # conv bias
            acc = jnp.maximum(acc, 0.0)                       # ReLU
            # Only windows fully inside [0, max_len) are valid (== PyTorch crop).
            # Post-ReLU values are >= 0 so masking with 0.0 preserves the max.
            valid = t_pos[:, :L_out, :] <= (max_len - k)
            acc = jnp.where(valid, acc, 0.0)
            pooled.append(jnp.max(acc, axis=1))               # (TB, Fn) max-pool over time

        # Lane-dense output slab: concat pooled features + zero padding to F_pad lanes.
        feat_parts = pooled
        if F_pad > n_f * Fn:
            feat_parts = pooled + [jnp.zeros((TB, F_pad - n_f * Fn), jnp.float32)]
        out_ref[...] = jnp.concatenate(feat_parts, axis=-1)   # (TB, F_pad)

    return kernel


def bert_cnn_forward(bert_token, bert_segment, params, filter_sizes,
                     compute_dtype=jnp.bfloat16):
    # --- BERT encoder (glue, plain JAX) ---
    # TODO(synk): the pretrained BERT encoder has no in-script equivalent; it is
    # stubbed with deterministic token + segment embedding lookups -> [B, L, bert_size].
    enc = (params["tok_emb"][bert_token] + params["seg_emb"][bert_segment]).astype(jnp.float32)

    B, L = bert_segment.shape
    max_seg_pos = jnp.argmax(bert_segment, axis=-1, keepdims=True)
    arange = jnp.arange(L)[None, :]
    sentence_mask = (arange <= max_seg_pos) & (bert_segment == 0)
    sentence_lens = jnp.sum(sentence_mask.astype(jnp.int32), axis=1)
    max_len = jnp.max(sentence_lens).astype(jnp.int32)

    Hb, Hc = params["wt"].shape
    Fn = params[f"conv_w_{filter_sizes[0]}"].shape[-1]
    n_f = len(filter_sizes)
    total_cols = sum(filter_sizes) * Fn
    F_pad = ((n_f * Fn + 127) // 128) * 128           # lane-dense output width

    # Host-side weight prep: stack all conv taps column-wise, cast matmul weights.
    w_blocks, b_blocks = [], []
    for k in filter_sizes:
        W = params[f"conv_w_{k}"]                     # (k, Hc, Fn)
        for j in range(k):
            w_blocks.append(W[j])
        b_blocks.append(params[f"conv_b_{k}"])        # (1, Fn)
    w_stack = jnp.concatenate(w_blocks, axis=1).astype(compute_dtype)   # (Hc, total_cols)
    b_stack = jnp.concatenate(b_blocks, axis=1).astype(jnp.float32)     # (1, n_f*Fn)
    wt = params["wt"].astype(compute_dtype)
    bt = params["bt"].astype(jnp.float32)

    # Batch blocking: TB examples per grid step (fold batch into matmul M dim).
    if B <= 8:
        TB, B_pad = B, B
    else:
        TB, B_pad = 8, ((B + 7) // 8) * 8

    enc_c = enc.astype(compute_dtype)
    mask3 = sentence_mask.astype(compute_dtype)[:, :, None]   # (B, L, 1)
    if B_pad != B:
        pad = B_pad - B
        enc_c = jnp.concatenate(
            [enc_c, jnp.zeros((pad, L, Hb), compute_dtype)], axis=0)
        mask3 = jnp.concatenate(
            [mask3, jnp.zeros((pad, L, 1), compute_dtype)], axis=0)

    kernel = make_kernel(tuple(filter_sizes), Fn, TB, L, F_pad, compute_dtype)

    in_specs = [
        pl.BlockSpec((TB, L, Hb), lambda b, ml: (b, 0, 0)),        # encoder block
        pl.BlockSpec((TB, L, 1), lambda b, ml: (b, 0, 0)),         # sentence mask block
        pl.BlockSpec((Hb, Hc), lambda b, ml: (0, 0)),              # sentence_transform W^T
        pl.BlockSpec((1, Hc), lambda b, ml: (0, 0)),               # sentence_transform bias
        pl.BlockSpec((Hc, total_cols), lambda b, ml: (0, 0)),      # stacked conv weights
        pl.BlockSpec((1, n_f * Fn), lambda b, ml: (0, 0)),         # stacked conv biases
    ]

    grid_spec = pltpu.PrefetchScalarGridSpec(
        num_scalar_prefetch=1,
        grid=(B_pad // TB,),
        in_specs=in_specs,
        out_specs=pl.BlockSpec((TB, F_pad), lambda b, ml: (b, 0)),
    )

    feat_padded = pl.pallas_call(
        kernel,
        grid_spec=grid_spec,
        out_shape=jax.ShapeDtypeStruct((B_pad, F_pad), jnp.float32),
        compiler_params=pltpu.CompilerParams(
            # batch axis is embarrassingly parallel -> lets v7x use both TCs;
            # tiny tiles, well under the scoped VMEM limit on every generation.
            dimension_semantics=("parallel",),
        ),
    )(jnp.reshape(max_len, (1,)), enc_c, mask3, wt, bt, w_stack, b_stack)

    # Final Linear(filter_nums*n_f -> num_categories, bias=False) as one plain
    # XLA matmul over the whole batch (hoisted out of the kernel).
    feat = feat_padded[:B, : n_f * Fn]
    return feat @ params["wlin"].astype(jnp.float32)


def reference(bert_token, bert_segment, params, filter_sizes):
    """Pure-JAX reference replicating the PyTorch forward (with the same BERT stub)."""
    enc = (params["tok_emb"][bert_token] + params["seg_emb"][bert_segment]).astype(jnp.float32)
    B, L = bert_segment.shape
    max_seg_pos = jnp.argmax(bert_segment, axis=-1, keepdims=True)
    arange = jnp.arange(L)[None, :]
    sentence_mask = (arange <= max_seg_pos) & (bert_segment == 0)
    lens = jnp.sum(sentence_mask.astype(jnp.int32), axis=1)
    max_len = int(jnp.max(lens))                       # dynamic crop, like .item()
    sent = enc[:, :max_len] * sentence_mask[:, :max_len, None]
    h = sent @ params["wt"] + params["bt"]
    outs = []
    for k in filter_sizes:
        W = params[f"conv_w_{k}"]                      # (k, Hc, Fn)
        bc = params[f"conv_b_{k}"]                     # (1, Fn)
        Lout = max_len - k + 1
        acc = jnp.zeros((B, Lout, W.shape[-1]), jnp.float32) + bc
        for j in range(k):
            acc = acc + jnp.einsum("blc,cf->blf", h[:, j:j + Lout, :], W[j])
        acc = jnp.maximum(acc, 0.0)
        outs.append(jnp.max(acc, axis=1))
    feat = jnp.concatenate(outs, axis=-1)
    return feat @ params["wlin"]


if __name__ == "__main__":
    key = jax.random.PRNGKey(0)
    B, L = 2, 16
    vocab = 30
    bert_size, cnn_size = 32, 32
    filter_sizes = (2, 3, 4)
    filter_nums = 8
    num_categories = 5

    keys = jax.random.split(key, 16)
    params = {
        "tok_emb": 0.1 * jax.random.normal(keys[0], (vocab, bert_size), jnp.float32),
        "seg_emb": 0.1 * jax.random.normal(keys[1], (2, bert_size), jnp.float32),
        # nn.Linear(bert_size, cnn_size): store W^T for x @ W^T + b
        "wt": 0.1 * jax.random.normal(keys[2], (bert_size, cnn_size), jnp.float32),
        "bt": 0.1 * jax.random.normal(keys[3], (1, cnn_size), jnp.float32),
        # nn.Linear(filter_nums*len(filter_size), num_categories, bias=False): store W^T
        "wlin": 0.1 * jax.random.normal(
            keys[12], (filter_nums * len(filter_sizes), num_categories), jnp.float32),
    }
    # nn.Conv1d(cnn_size, filter_nums, k) weights, re-laid-out to (k, cnn_size, filter_nums)
    for i, k in enumerate(filter_sizes):
        params[f"conv_w_{k}"] = 0.1 * jax.random.normal(
            keys[4 + i], (k, cnn_size, filter_nums), jnp.float32)
        params[f"conv_b_{k}"] = 0.1 * jax.random.normal(
            keys[8 + i], (1, filter_nums), jnp.float32)

    bert_token = jax.random.randint(keys[13], (B, L), 0, vocab)
    # typical BERT segment ids: 0 for sentence A, then 1 for sentence B
    sep = jnp.array([6, 9])
    bert_segment = (jnp.arange(L)[None, :] >= sep[:, None]).astype(jnp.int32)

    ref = reference(bert_token, bert_segment, params, filter_sizes)

    # f32 path: tight check against the pure-JAX reference.
    out_f32 = bert_cnn_forward(bert_token, bert_segment, params, filter_sizes,
                               compute_dtype=jnp.float32)
    out_f32 = jax.block_until_ready(out_f32)
    assert out_f32.shape == (B, num_categories)
    assert jnp.allclose(out_f32, ref, atol=5e-4, rtol=5e-4), (out_f32, ref)

    # bf16 fast path (v6e/v7x MXU-native, f32 accumulation): looser tolerance.
    out_bf16 = bert_cnn_forward(bert_token, bert_segment, params, filter_sizes,
                                compute_dtype=jnp.bfloat16)
    out_bf16 = jax.block_until_ready(out_bf16)
    assert out_bf16.shape == (B, num_categories)
    assert jnp.allclose(out_bf16, ref, atol=2e-2, rtol=2e-2), (out_bf16, ref)

    print("KERNEL_OK")
</pallas_src>

<mosaic_0001>
module attributes {stable_mosaic.version = 11 : i64} {
  func.func @kernel(%arg0: i32, %arg1: memref<1xi32, #tpu.memory_space<smem>>, %arg2: memref<2x16x32xf32, #tpu.memory_space<vmem>>, %arg3: memref<2x16x1xf32, #tpu.memory_space<vmem>>, %arg4: memref<32x32xf32, #tpu.memory_space<vmem>>, %arg5: memref<1x32xf32, #tpu.memory_space<vmem>>, %arg6: memref<32x72xf32, #tpu.memory_space<vmem>>, %arg7: memref<1x24xf32, #tpu.memory_space<vmem>>, %arg8: memref<2x128xf32, #tpu.memory_space<vmem>>) attributes {dimension_semantics = [#tpu.dimension_semantics<parallel>], iteration_bounds = array<i64: 1>, scalar_prefetch = 1 : i64, scratch_operands = 0 : i64, tpu.core_type = #tpu.core_type<tc>, window_params = [{transform_indices = @transform_0, window_bounds = array<i64: 2, 16, 32>}, {transform_indices = @transform_1, window_bounds = array<i64: 2, 16, 1>}, {pipeline_mode = #tpu.pipeline_mode<synchronous>, transform_indices = @transform_2, window_bounds = array<i64: 32, 32>}, {pipeline_mode = #tpu.pipeline_mode<synchronous>, transform_indices = @transform_3, window_bounds = array<i64: 1, 32>}, {pipeline_mode = #tpu.pipeline_mode<synchronous>, transform_indices = @transform_4, window_bounds = array<i64: 32, 72>}, {pipeline_mode = #tpu.pipeline_mode<synchronous>, transform_indices = @transform_5, window_bounds = array<i64: 1, 24>}, {transform_indices = @transform_6, window_bounds = array<i64: 2, 128>}]} {
    %c0 = arith.constant 0 : index
    %0 = memref.load %arg1[%c0] : memref<1xi32, #tpu.memory_space<smem>>
    %c0_0 = arith.constant 0 : index
    %c0_1 = arith.constant 0 : index
    %c0_2 = arith.constant 0 : index
    %1 = vector.load %arg2[%c0_0, %c0_1, %c0_2] : memref<2x16x32xf32, #tpu.memory_space<vmem>>, vector<2x16x32xf32>
    %c0_3 = arith.constant 0 : index
    %c0_4 = arith.constant 0 : index
    %c0_5 = arith.constant 0 : index
    %2 = vector.load %arg3[%c0_3, %c0_4, %c0_5] : memref<2x16x1xf32, #tpu.memory_space<vmem>>, vector<2x16x1xf32>
    %3 = vector.broadcast %2 : vector<2x16x1xf32> to vector<2x16x32xf32>
    %4 = arith.mulf %1, %3 : vector<2x16x32xf32>
    %5 = vector.shape_cast %4 : vector<2x16x32xf32> to vector<32x32xf32>
    %c0_6 = arith.constant 0 : index
    %c0_7 = arith.constant 0 : index
    %6 = vector.load %arg4[%c0_6, %c0_7] : memref<32x32xf32, #tpu.memory_space<vmem>>, vector<32x32xf32>
    %cst = arith.constant dense<0.000000e+00> : vector<32x32xf32>
    %7 = tpu.matmul %5, %6, %cst {dimension_numbers = #tpu.dot_dimension_numbers<[1], [0], [0], [1], [0, 0, 1, 1], [], []>} : vector<32x32xf32>, vector<32x32xf32>, vector<32x32xf32> -> vector<32x32xf32>
    %c0_8 = arith.constant 0 : index
    %c0_9 = arith.constant 0 : index
    %8 = vector.load %arg5[%c0_8, %c0_9] : memref<1x32xf32, #tpu.memory_space<vmem>>, vector<1x32xf32>
    %9 = vector.broadcast %8 : vector<1x32xf32> to vector<32x32xf32>
    %10 = arith.addf %7, %9 : vector<32x32xf32>
    %c0_10 = arith.constant 0 : index
    %c0_11 = arith.constant 0 : index
    %11 = vector.load %arg6[%c0_10, %c0_11] : memref<32x72xf32, #tpu.memory_space<vmem>>, vector<32x72xf32>
    %cst_12 = arith.constant dense<0.000000e+00> : vector<32x72xf32>
    %12 = tpu.matmul %10, %11, %cst_12 {dimension_numbers = #tpu.dot_dimension_numbers<[1], [0], [0], [1], [0, 0, 1, 1], [], []>} : vector<32x32xf32>, vector<32x72xf32>, vector<32x72xf32> -> vector<32x72xf32>
    %13 = vector.shape_cast %12 : vector<32x72xf32> to vector<2x16x72xf32>
    %c0_13 = arith.constant 0 : index
    %c0_14 = arith.constant 0 : index
    %14 = vector.load %arg7[%c0_13, %c0_14] : memref<1x24xf32, #tpu.memory_space<vmem>>, vector<1x24xf32>
    %15 = tpu.iota {dimensions = array<i32: 1>} : vector<1x16x1xi32>
    %16 = vector.extract_strided_slice %13 {offsets = [0, 0, 0], sizes = [2, 15, 8], strides = [1, 1, 1]} : vector<2x16x72xf32> to vector<2x15x8xf32>
    %17 = vector.extract_strided_slice %13 {offsets = [0, 1, 8], sizes = [2, 15, 8], strides = [1, 1, 1]} : vector<2x16x72xf32> to vector<2x15x8xf32>
    %18 = arith.addf %16, %17 : vector<2x15x8xf32>
    %19 = vector.extract_strided_slice %14 {offsets = [0, 0], sizes = [1, 8], strides = [1, 1]} : vector<1x24xf32> to vector<1x8xf32>
    %20 = vector.shape_cast %19 : vector<1x8xf32> to vector<1x1x8xf32>
    %21 = vector.broadcast %20 : vector<1x1x8xf32> to vector<2x15x8xf32>
    %22 = arith.addf %18, %21 : vector<2x15x8xf32>
    %cst_15 = arith.constant 0.000000e+00 : f32
    %23 = vector.broadcast %cst_15 : f32 to vector<2x15x8xf32>
    %24 = arith.maximumf %22, %23 : vector<2x15x8xf32>
    %25 = vector.extract_strided_slice %15 {offsets = [0, 0, 0], sizes = [1, 15, 1], strides = [1, 1, 1]} : vector<1x16x1xi32> to vector<1x15x1xi32>
    %c2_i32 = arith.constant 2 : i32
    %26 = arith.subi %0, %c2_i32 : i32
    %27 = vector.broadcast %26 : i32 to vector<1x15x1xi32>
    %28 = arith.cmpi sle, %25, %27 : vector<1x15x1xi32>
    %cst_16 = arith.constant 0.000000e+00 : f32
    %29 = vector.shape_cast %28 : vector<1x15x1xi1> to vector<1x15x1xi1>
    %30 = vector.broadcast %29 : vector<1x15x1xi1> to vector<2x15x8xi1>
    %31 = vector.broadcast %cst_16 : f32 to vector<2x15x8xf32>
    %32 = arith.select %30, %24, %31 : vector<2x15x8xi1>, vector<2x15x8xf32>
    %cst_17 = arith.constant dense<0xFF800000> : vector<2x8xf32>
    %33 = vector.multi_reduction <maximumf>, %32, %cst_17 [1] : vector<2x15x8xf32> to vector<2x8xf32>
    %34 = vector.extract_strided_slice %13 {offsets = [0, 0, 16], sizes = [2, 14, 8], strides = [1, 1, 1]} : vector<2x16x72xf32> to vector<2x14x8xf32>
    %35 = vector.extract_strided_slice %13 {offsets = [0, 1, 24], sizes = [2, 14, 8], strides = [1, 1, 1]} : vector<2x16x72xf32> to vector<2x14x8xf32>
    %36 = arith.addf %34, %35 : vector<2x14x8xf32>
    %37 = vector.extract_strided_slice %13 {offsets = [0, 2, 32], sizes = [2, 14, 8], strides = [1, 1, 1]} : vector<2x16x72xf32> to vector<2x14x8xf32>
    %38 = arith.addf %36, %37 : vector<2x14x8xf32>
    %39 = vector.extract_strided_slice %14 {offsets = [0, 8], sizes = [1, 8], strides = [1, 1]} : vector<1x24xf32> to vector<1x8xf32>
    %40 = vector.shape_cast %39 : vector<1x8xf32> to vector<1x1x8xf32>
    %41 = vector.broadcast %40 : vector<1x1x8xf32> to vector<2x14x8xf32>
    %42 = arith.addf %38, %41 : vector<2x14x8xf32>
    %cst_18 = arith.constant 0.000000e+00 : f32
    %43 = vector.broadcast %cst_18 : f32 to vector<2x14x8xf32>
    %44 = arith.maximumf %42, %43 : vector<2x14x8xf32>
    %45 = vector.extract_strided_slice %15 {offsets = [0, 0, 0], sizes = [1, 14, 1], strides = [1, 1, 1]} : vector<1x16x1xi32> to vector<1x14x1xi32>
    %c3_i32 = arith.constant 3 : i32
    %46 = arith.subi %0, %c3_i32 : i32
    %47 = vector.broadcast %46 : i32 to vector<1x14x1xi32>
    %48 = arith.cmpi sle, %45, %47 : vector<1x14x1xi32>
    %cst_19 = arith.constant 0.000000e+00 : f32
    %49 = vector.shape_cast %48 : vector<1x14x1xi1> to vector<1x14x1xi1>
    %50 = vector.broadcast %49 : vector<1x14x1xi1> to vector<2x14x8xi1>
    %51 = vector.broadcast %cst_19 : f32 to vector<2x14x8xf32>
    %52 = arith.select %50, %44, %51 : vector<2x14x8xi1>, vector<2x14x8xf32>
    %cst_20 = arith.constant dense<0xFF800000> : vector<2x8xf32>
    %53 = vector.multi_reduction <maximumf>, %52, %cst_20 [1] : vector<2x14x8xf32> to vector<2x8xf32>
    %54 = vector.extract_strided_slice %13 {offsets = [0, 0, 40], sizes = [2, 13, 8], strides = [1, 1, 1]} : vector<2x16x72xf32> to vector<2x13x8xf32>
    %55 = vector.extract_strided_slice %13 {offsets = [0, 1, 48], sizes = [2, 13, 8], strides = [1, 1, 1]} : vector<2x16x72xf32> to vector<2x13x8xf32>
    %56 = arith.addf %54, %55 : vector<2x13x8xf32>
    %57 = vector.extract_strided_slice %13 {offsets = [0, 2, 56], sizes = [2, 13, 8], strides = [1, 1, 1]} : vector<2x16x72xf32> to vector<2x13x8xf32>
    %58 = arith.addf %56, %57 : vector<2x13x8xf32>
    %59 = vector.extract_strided_slice %13 {offsets = [0, 3, 64], sizes = [2, 13, 8], strides = [1, 1, 1]} : vector<2x16x72xf32> to vector<2x13x8xf32>
    %60 = arith.addf %58, %59 : vector<2x13x8xf32>
    %61 = vector.extract_strided_slice %14 {offsets = [0, 16], sizes = [1, 8], strides = [1, 1]} : vector<1x24xf32> to vector<1x8xf32>
    %62 = vector.shape_cast %61 : vector<1x8xf32> to vector<1x1x8xf32>
    %63 = vector.broadcast %62 : vector<1x1x8xf32> to vector<2x13x8xf32>
    %64 = arith.addf %60, %63 : vector<2x13x8xf32>
    %cst_21 = arith.constant 0.000000e+00 : f32
    %65 = vector.broadcast %cst_21 : f32 to vector<2x13x8xf32>
    %66 = arith.maximumf %64, %65 : vector<2x13x8xf32>
    %67 = vector.extract_strided_slice %15 {offsets = [0, 0, 0], sizes = [1, 13, 1], strides = [1, 1, 1]} : vector<1x16x1xi32> to vector<1x13x1xi32>
    %c4_i32 = arith.constant 4 : i32
    %68 = arith.subi %0, %c4_i32 : i32
    %69 = vector.broadcast %68 : i32 to vector<1x13x1xi32>
    %70 = arith.cmpi sle, %67, %69 : vector<1x13x1xi32>
    %cst_22 = arith.constant 0.000000e+00 : f32
    %71 = vector.shape_cast %70 : vector<1x13x1xi1> to vector<1x13x1xi1>
    %72 = vector.broadcast %71 : vector<1x13x1xi1> to vector<2x13x8xi1>
    %73 = vector.broadcast %cst_22 : f32 to vector<2x13x8xf32>
    %74 = arith.select %72, %66, %73 : vector<2x13x8xi1>, vector<2x13x8xf32>
    %cst_23 = arith.constant dense<0xFF800000> : vector<2x8xf32>
    %75 = vector.multi_reduction <maximumf>, %74, %cst_23 [1] : vector<2x13x8xf32> to vector<2x8xf32>
    %cst_24 = arith.constant 0.000000e+00 : f32
    %76 = vector.broadcast %cst_24 : f32 to vector<2x104xf32>
    %77 = tpu.concatenate %33, %53, %75, %76 in 1 : vector<2x8xf32>, vector<2x8xf32>, vector<2x8xf32>, vector<2x104xf32> -> vector<2x128xf32>
    %c0_25 = arith.constant 0 : index
    %c0_26 = arith.constant 0 : index
    %78 = vector.load %arg8[%c0_25, %c0_26] : memref<2x128xf32, #tpu.memory_space<vmem>>, vector<2x128xf32>
    tpu.vector_store %arg8[%c0_25, %c0_26], %77 {strides = array<i32>} : memref<2x128xf32, #tpu.memory_space<vmem>>, vector<2x128xf32>,
    return
  }
  func.func @transform_0(%arg0: i32, %arg1: memref<1xi32, #tpu.memory_space<smem>>) -> (i32, i32, i32) {
    %c0_i32 = arith.constant 0 : i32
    %c0_i32_0 = arith.constant 0 : i32
    %c0_i32_1 = arith.constant 0 : i32
    return %arg0, %c0_i32, %c0_i32_0 : i32, i32, i32
  }
  func.func @transform_1(%arg0: i32, %arg1: memref<1xi32, #tpu.memory_space<smem>>) -> (i32, i32, i32) {
    %c0_i32 = arith.constant 0 : i32
    %c0_i32_0 = arith.constant 0 : i32
    %c0_i32_1 = arith.constant 0 : i32
    return %arg0, %c0_i32, %c0_i32_0 : i32, i32, i32
  }
  func.func @transform_2(%arg0: i32, %arg1: memref<1xi32, #tpu.memory_space<smem>>) -> (i32, i32) {
    %c0_i32 = arith.constant 0 : i32
    %c0_i32_0 = arith.constant 0 : i32
    %c0_i32_1 = arith.constant 0 : i32
    return %c0_i32, %c0_i32_0 : i32, i32
  }
  func.func @transform_3(%arg0: i32, %arg1: memref<1xi32, #tpu.memory_space<smem>>) -> (i32, i32) {
    %c0_i32 = arith.constant 0 : i32
    %c0_i32_0 = arith.constant 0 : i32
    %c0_i32_1 = arith.constant 0 : i32
    return %c0_i32, %c0_i32_0 : i32, i32
  }
  func.func @transform_4(%arg0: i32, %arg1: memref<1xi32, #tpu.memory_space<smem>>) -> (i32, i32) {
    %c0_i32 = arith.constant 0 : i32
    %c0_i32_0 = arith.constant 0 : i32
    %c0_i32_1 = arith.constant 0 : i32
    return %c0_i32, %c0_i32_0 : i32, i32
  }
  func.func @transform_5(%arg0: i32, %arg1: memref<1xi32, #tpu.memory_space<smem>>) -> (i32, i32) {
    %c0_i32 = arith.constant 0 : i32
    %c0_i32_0 = arith.constant 0 : i32
    %c0_i32_1 = arith.constant 0 : i32
    return %c0_i32, %c0_i32_0 : i32, i32
  }
  func.func @transform_6(%arg0: i32, %arg1: memref<1xi32, #tpu.memory_space<smem>>) -> (i32, i32) {
    %c0_i32 = arith.constant 0 : i32
    %c0_i32_0 = arith.constant 0 : i32
    return %arg0, %c0_i32 : i32, i32
  }
}

</mosaic_0001>

<bundles_post_ra>
// kernel: tpu_custom_call.1
= control target key start
LH: loop header
LB: loop body
LE: loop exit
PB: predicated region body
PF: predicated region fallthrough
CT: control target
= control target key end

     0   :  { %13 = vsyncpa [#allocation5], 0  ;;  %s905_s0 = inlined_call_operand.<no memory space> [shape: s32[1], index: 0, kind: input, shape index: {}]   ;;  %s906_s1 = inlined_call_operand.vmem [shape: f32[2,16,32], index: 1, kind: input, shape index: {}]   ;;  %s907_s2 = inlined_call_operand.vmem [shape: f32[2,16,1], index: 2, kind: input, shape index: {}]   ;;  %s908_s3 = inlined_call_operand.hbm [shape: f32[32,32], index: 3, kind: input, shape index: {}]   ;;  %s909_s4 = inlined_call_operand.vmem [shape: f32[1,32], index: 4, kind: input, shape index: {}]   ;;  %s910_s5 = inlined_call_operand.hbm [shape: f32[32,72], index: 5, kind: input, shape index: {}]   ;;  %s911_s6 = inlined_call_operand.vmem [shape: f32[1,24], index: 6, kind: input, shape index: {}]   ;;  %s912_s7 = inlined_call_operand.hbm [shape: f32[2,128], index: 7, kind: output, shape index: {}]  }
   0x1   :  { %14 = vsyncpa [#allocation8], 0 }
   0x2   :  { %15 = vsyncpa [#allocation6], 0  ;;  %s702_s24 = smov [#allocation4]   ;;  %s630_s28 = scalar_lea.hbm %s908_s3, 512 }
   0x3   :  { %s25_s25 = sshll.u32 %s702_s24, 4  ;;  %p631_p0 = scmp.ne.s32.totalorder %s908_s3, %s630_s28  ;;  %s26_s25 = int_to_ptr.vmem [resolvable:$true] %s25_s25 }
   0x4   :  { %p634_p1 = scmp.lt.u32.totalorder %s630_s28, %s908_s3 }
   0x6   :  { %p636_p2 = pnand %p634_p1, %p631_p0 }
   0x8   :  { %639 = shalt.err (!%p636_p2)
}
   0x9   :  { %s640_s10 = scalar_lea.vmem %s26_s25, 512  ;;  %p645_p4 = scmp.lt.s32.totalorder %s26_s25, %s26_s25 }
   0xa   :  { %p641_p3 = scmp.ne.s32.totalorder %s26_s25, %s640_s10  ;;  %p646_p5 = scmp.lt.s32.totalorder %s640_s10, %s640_s10 }
   0xc   :  { %p647_p6 = por %p646_p5, %p645_p4 }
   0xe   :  { %p648_p7 = pnand %p647_p6, %p641_p3 }
  0x10   :  { %651 = shalt.err (!%p648_p7)
}
  0x11   :  { %s703_s11 = smov 128   ;;  %s704_s12 = smov 8  }
  0x12   :  { %31 = dma.hbm_to_vmem [thread:$0]  %s908_s3, 512, %s26_s25, [#allocation5], %s703_s11, %s703_s11, %s704_s12  }
  0x13   :  { %s705_s15 = smov [#allocation7]   ;;  %s652_s19 = scalar_lea.hbm %s910_s5, 512 }
  0x14   :  { %s39_s16 = sshll.u32 %s705_s15, 4  ;;  %p653_p8 = scmp.ne.s32.totalorder %s910_s5, %s652_s19  ;;  %s40_s16 = int_to_ptr.vmem [resolvable:$true] %s39_s16 }
  0x15   :  { %p656_p9 = scmp.lt.u32.totalorder %s652_s19, %s910_s5 }
  0x17   :  { %p658_p10 = pnand %p656_p9, %p653_p8 }
  0x19   :  { %661 = shalt.err (!%p658_p10)
}
  0x1a   :  { %s662_s24 = scalar_lea.vmem %s40_s16, 512  ;;  %p667_p12 = scmp.lt.s32.totalorder %s40_s16, %s40_s16 }
  0x1b   :  { %p663_p11 = scmp.ne.s32.totalorder %s40_s16, %s662_s24  ;;  %p668_p13 = scmp.lt.s32.totalorder %s662_s24, %s662_s24 }
  0x1d   :  { %p669_p0 = por %p668_p13, %p667_p12 }
  0x1f   :  { %p670_p1 = pnand %p669_p0, %p663_p11 }
  0x21   :  { %673 = shalt.err (!%p670_p1)
}
  0x22   :  { %45 = dma.hbm_to_vmem [thread:$0]  %s910_s5, 512, %s40_s16, [#allocation8], %s703_s11, %s703_s11, %s704_s12  }
  0x23   :  { %696 = dma.done.wait [#allocation5], 512  }
  0x24   :  { %697 = vsyncadd [#allocation5], 4294966784 }
  0x25   :  { %698 = dma.done.wait [#allocation8], 512  }
  0x26   :  { %699 = vsyncadd [#allocation8], 4294966784  ;;  %v706_v0 = vmov 0   ;;  %v59_v1 = vld [vmem:[%s907_s2] sm:$0xff]  ;;  %v61_v2 = vld [vmem:[%s907_s2 + $0x10] sm:$0xff]  ;;  %vm98_vm0 = vcmask 261120   ;;  %v298_v61 = vlaneseq }
  0x27   :  { %628 = vset.pattern.permute.xlu0 %v706_v0  ;;  %629 = vset.pattern.permute.xlu1 %v706_v0  ;;  %v60_v3 = vld [vmem:[%s907_s2 + $0x8] sm:$0xff]  ;;  %v87_v4 = vld [vmem:[#allocation4] sm:$0xff]  ;;  %v62_v6 = vld [vmem:[%s907_s2 + $0x18] sm:$0xff]  ;;  %vm305_vm1 = vcmask 1046528   ;;  %vm374_vm2 = vcmask 1045504   ;;  %vm440_vm3 = vcmask 1044480  }
  0x28   :  { %65 = vperm.xlu0 %628, %v59_v1   ;;  %75 = vperm.xlu1 %629, %v61_v2   ;;  %v88_v5 = vld [vmem:[#allocation4 + $0x8] sm:$0xff]  ;;  %v89_v8 = vld [vmem:[#allocation4 + $0x10] sm:$0xff]  ;;  %v90_v9 = vld [vmem:[#allocation4 + $0x18] sm:$0xff]  ;;  %s709_s20 = smov 104   ;;  %s710_s23 = smov 24   ;;  %v831_v62 = vshrl.u32 %v298_v61, 7 }
  0x29   :  { %v602_v7 = vpack.c.bf16 %v88_v5, %v87_v4  ;;  %v606_v10 = vpack.c.bf16 %v90_v9, %v89_v8  ;;  %v196_v11 = vld [vmem:[#allocation7] sm:$0xff]  ;;  %v197_v12 = vld [vmem:[#allocation7 + $0x8] sm:$0xff]  ;;  %v57_v18 = vld [vmem:[%s906_s1 + $0x10] sm:$0xff]  ;;  %s555_s25 = sadd.s32 4294967294, %s905_s0  ;;  %vm356_vm6 = vcmask 63488   ;;  %vm354_vm7 = vcmask 64512  }
  0x2a   :  { %v610_v13 = vpack.c.bf16 %v197_v12, %v196_v11  ;;  %v55_v14 = vld [vmem:[%s906_s1] sm:$0xff]  ;;  %v56_v19 = vld [vmem:[%s906_s1 + $0x8] sm:$0xff]  ;;  %v58_v23 = vld [vmem:[%s906_s1 + $0x18] sm:$0xff]  ;;  %s707_s1 = smov 120   ;;  %v837_v63 = vadd.s32 8, %v831_v62  ;;  %v343_v1 = vstv %s555_s25  ;;  %s557_s26 = sadd.s32 4294967292, %s905_s0 }
  0x2b   :  { %603 = vmatprep.subr.bf16.mxu0 %v602_v7  ;;  %v198_v26 = vld [vmem:[#allocation7 + $0x10] sm:$0xff]  ;;  %v199_v27 = vld [vmem:[#allocation7 + $0x18] sm:$0xff]  ;;  %v545_v29 = vld [vmem:[%s909_s4] ss:$0 sm:$0xff]  ;;  %s708_s4 = smov 112   ;;  %vm344_vm5 = vcmp.le.s32.totalorder %v831_v62, %v343_v1  ;;  %s556_s29 = sadd.s32 4294967293, %s905_s0 }
  0x2c   :  { %70 = vperm.xlu0 %628, %v60_v3   ;;  %80 = vperm.xlu1 %629, %v62_v6   ;;  %v614_v28 = vpack.c.bf16 %v199_v27, %v198_v26  ;;  %v554_v60 = vld [vmem:[%s911_s6] ss:$0 sm:$0xff]  ;;  %vm345_vm4 = vcmp.le.s32.totalorder %v837_v63, %v343_v1  ;;  %vm486_vm8 = vcmask 392512   ;;  %vm488_vm9 = vcmask 389440   ;;  %s711_s0 = smov [#allocation9]  }
  0x2d   :  { %605 = vmatpush3.bf16.msra.mxu0 %v602_v7  ;;  %611 = vmatprep.subr.bf16.mxu1 %v610_v13  ;;  %vm420_vm14 = vcmask 195712   ;;  %vm422_vm15 = vcmask 193664   ;;  %s535_s30 = sshll.u32 %s711_s0, 4  ;;  %s536_s30 = int_to_ptr.vmem [resolvable:$true] %s535_s30 }
  0x2e   :  { %607 = vmatprep.subr.bf16.mxu0 %v606_v10  ;;  %613 = vmatpush3.bf16.msra.mxu1 %v610_v13  ;;  %s674_s8 = scalar_lea.vmem %s536_s30, 32  ;;  %p679_p3 = scmp.lt.s32.totalorder %s536_s30, %s536_s30 }
  0x2f   :  { %615 = vmatprep.subr.bf16.mxu1 %v614_v28  ;;  %p675_p2 = scmp.ne.s32.totalorder %s536_s30, %s674_s8  ;;  %p680_p4 = scmp.lt.s32.totalorder %s674_s8, %s674_s8 }
  0x31   :  { %609 = vmatpush3.bf16.msra.mxu0 %v606_v10  ;;  %p681_p5 = por %p680_p4, %p679_p3 }
  0x32   :  { %617 = vmatpush3.bf16.msra.mxu1 %v614_v28 }
  0x33   :  { %p682_p6 = pnand %p681_p5, %p675_p2 }
  0xa7   :  { %v66_v15 = vpop.permute.xlu0 %65  ;;  %v76_v16 = vpop.permute.xlu1 %75 }
  0xa8   :  { %v83_v17 = vmul.f32 %v66_v15, %v55_v14  ;;  %v85_v21 = vmul.f32 %v76_v16, %v57_v18 }
  0xaa   :  { %582 = vmatprep.mubr.msk.f32.mxu0 %vm98_vm0, %v83_v17 }
  0xab   :  { %v71_v20 = vpop.permute.xlu0 %70  ;;  %v81_v22 = vpop.permute.xlu1 %80 }
  0xac   :  { %v84_v24 = vmul.f32 %v71_v20, %v56_v19  ;;  %v86_v25 = vmul.f32 %v81_v22, %v58_v23 }
  0xae   :  { %583 = vmatmul.mubr.msk.f32.vlgmr.msra.gmra.mrb[0].mxu0 %vm98_vm0, %v84_v24 }
  0xaf   :  { %585 = vmatprep.mubr.msk.f32.mxu0 %vm98_vm0, %v85_v21 }
  0xb2   :  { %586 = vmatmul.mubr.msk.f32.gmra.mrb[2].mxu0 %vm98_vm0, %v86_v25 }
 0x181   :  { %v584_v30 = vpop.f32.mrb[0].mxu0 }
 0x182   :  { %v177_v31 = vpop.f32.mrb[1].mxu0  ;;  %v183_v33 = vadd.f32 %v584_v30, %v545_v29 }
 0x183   :  { %v178_v32 = vadd.f32 %v545_v29, %v177_v31 }
 0x185   :  { %596 = vmatprep.mubr.msk.f32.mxu1 %vm98_vm0, %v178_v32  ;;  %v587_v34 = vpop.f32.mrb[2].mxu0  ;;  %v475_v32 = vstv %s557_s26 }
 0x186   :  { %v193_v35 = vadd.f32 %v587_v34, %v545_v29  ;;  %597 = vmatmul.mubr.msk.f32.vlgmr.msra.gmra.mrb[0].mxu1 %vm98_vm0, %v183_v33  ;;  %v187_v36 = vpop.f32.mrb[3].mxu0  ;;  %v409_v33 = vstv %s556_s29  ;;  %vm476_vm10 = vcmp.le.s32.totalorder %v831_v62, %v475_v32  ;;  %vm477_vm11 = vcmp.le.s32.totalorder %v837_v63, %v475_v32 }
 0x187   :  { %v188_v37 = vadd.f32 %v545_v29, %v187_v36  ;;  %vm410_vm12 = vcmp.le.s32.totalorder %v831_v62, %v409_v33  ;;  %vm411_vm13 = vcmp.le.s32.totalorder %v837_v63, %v409_v33 }
 0x189   :  { %599 = vmatprep.mubr.msk.f32.mxu1 %vm98_vm0, %v188_v37 }
 0x18a   :  { %600 = vmatmul.mubr.msk.f32.gmra.mrb[2].mxu1 %vm98_vm0, %v193_v35  ;;  %vm508_vm0 = vcmask 1041409  }
 0x259   :  { %v598_v38 = vpop.f32.mrb[0].mxu1 }
 0x25a   :  { %v278_v39 = vpop.f32.mrb[1].mxu1  ;;  %v307_v40 = vrot.slane %v598_v38, 1  ;;  %v376_v41 = vrot.slane %v598_v38, 2  ;;  %v442_v42 = vrot.slane %v598_v38, 3 }
 0x25b   :  { %v306_v43 = vrot.slane %v278_v39, 1  ;;  %v375_v44 = vrot.slane %v278_v39, 2  ;;  %v441_v45 = vrot.slane %v278_v39, 3 }
 0x25c   :  { %314 = vrot.lane.b32.xlu1 %v307_v40, %s707_s1 }
 0x25d   :  { %v308_v46 = vsel %vm305_vm1, %v306_v43, %v307_v40  ;;  %v601_v47 = vpop.f32.mrb[2].mxu1  ;;  %v377_v48 = vsel %vm374_vm2, %v375_v44, %v376_v41  ;;  %v443_v49 = vsel %vm440_vm3, %v441_v45, %v442_v42 }
 0x25e   :  { %312 = vrot.lane.b32.xlu0 %v308_v46, %s707_s1  ;;  %v288_v50 = vpop.f32.mrb[3].mxu1  ;;  %v310_v51 = vrot.slane %v601_v47, 1  ;;  %v379_v52 = vrot.slane %v601_v47, 2  ;;  %v445_v53 = vrot.slane %v601_v47, 3 }
 0x25f   :  { %v309_v54 = vrot.slane %v288_v50, 1  ;;  %v378_v55 = vrot.slane %v288_v50, 2  ;;  %v444_v56 = vrot.slane %v288_v50, 3 }
 0x260   :  { %383 = vrot.lane.b32.xlu1 %v376_v41, %s708_s4 }
 0x261   :  { %v311_v57 = vsel %vm305_vm1, %v309_v54, %v310_v51  ;;  %v380_v58 = vsel %vm374_vm2, %v378_v55, %v379_v52  ;;  %v446_v59 = vsel %vm440_vm3, %v444_v56, %v445_v53  ;;  %vm524_vm1 = vcmask 130048  }
 0x262   :  { %381 = vrot.lane.b32.xlu0 %v377_v48, %s708_s4  ;;  %vm526_vm2 = vcmask 195584  }
 0x264   :  { %449 = vrot.lane.b32.xlu1 %v442_v42, %s709_s20 }
 0x266   :  { %447 = vrot.lane.b32.xlu0 %v443_v49, %s709_s20 }
 0x268   :  { %318 = vrot.lane.b32.xlu1 %v310_v51, %s707_s1 }
 0x26a   :  { %316 = vrot.lane.b32.xlu0 %v311_v57, %s707_s1 }
 0x26c   :  { %387 = vrot.lane.b32.xlu1 %v379_v52, %s708_s4 }
 0x26e   :  { %385 = vrot.lane.b32.xlu0 %v380_v58, %s708_s4 }
 0x270   :  { %453 = vrot.lane.b32.xlu1 %v445_v53, %s709_s20 }
 0x272   :  { %451 = vrot.lane.b32.xlu0 %v446_v59, %s709_s20 }
 0x274   :  { %463 = vrot.lane.b32.xlu1 %v554_v60, %s710_s23 }
 0x276   :  { %397 = vrot.lane.b32.xlu0 %v554_v60, %s704_s12 }
 0x2ce   :  { %v315_v0 = vpop.permute.xlu1 %314 }
 0x2cf   :  { %v325_v2 = vadd.f32 %v598_v38, %v315_v0 }
 0x2d0   :  { %v313_v3 = vpop.permute.xlu0 %312 }
 0x2d1   :  { %v335_v4 = vadd.f32 %v554_v60, %v325_v2  ;;  %v324_v5 = vadd.f32 %v313_v3, %v278_v39 }
 0x2d2   :  { %v384_v6 = vpop.permute.xlu1 %383 }
 0x2d3   :  { %v339_v7 = vmax.f32 %v335_v4, 0.0  ;;  %v334_v8 = vadd.f32 %v554_v60, %v324_v5  ;;  %v394_v30 = vadd.f32 %v384_v6, %v325_v2 }
 0x2d4   :  { %v382_v9 = vpop.permute.xlu0 %381 }
 0x2d5   :  { %v351_v10 = vsel %vm345_vm4, %v339_v7, 0.0  ;;  %v338_v11 = vmax.f32 %v334_v8, 0.0  ;;  %v393_v34 = vadd.f32 %v382_v9, %v324_v5 }
 0x2d6   :  { %v450_v12 = vpop.permute.xlu1 %449  ;;  %v357_v14 = vsel %vm356_vm6, %v351_v10, -inf }
 0x2d7   :  { %v350_v13 = vsel %vm344_vm5, %v338_v11, 0.0  ;;  %v460_v38 = vadd.f32 %v450_v12, %v394_v30 }
 0x2d8   :  { %v448_v15 = vpop.permute.xlu0 %447  ;;  %v355_v16 = vsel %vm354_vm7, %v350_v13, -inf }
 0x2d9   :  { %v358_v17 = vmax.f32 %v355_v16, %v357_v14  ;;  %v459_v43 = vadd.f32 %v448_v15, %v393_v34 }
 0x2da   :  { %v319_v18 = vpop.permute.xlu1 %318 }
 0x2db   :  { %v327_v19 = vadd.f32 %v601_v47, %v319_v18  ;;  %v359_v27 = vrot.slane %v358_v17, 4 }
 0x2dc   :  { %v317_v20 = vpop.permute.xlu0 %316 }
 0x2dd   :  { %v337_v21 = vadd.f32 %v554_v60, %v327_v19  ;;  %v326_v22 = vadd.f32 %v317_v20, %v288_v50  ;;  %v360_v41 = vmax.f32 %v358_v17, %v359_v27 }
 0x2de   :  { %v388_v23 = vpop.permute.xlu1 %387 }
 0x2df   :  { %v341_v24 = vmax.f32 %v337_v21, 0.0  ;;  %v336_v25 = vadd.f32 %v554_v60, %v326_v22  ;;  %v396_v36 = vadd.f32 %v388_v23, %v327_v19  ;;  %v361_v53 = vrot.slane %v360_v41, 2 }
 0x2e0   :  { %v386_v26 = vpop.permute.xlu0 %385 }
 0x2e1   :  { %v353_v28 = vsel %vm345_vm4, %v341_v24, 0.0  ;;  %v340_v29 = vmax.f32 %v336_v25, 0.0  ;;  %v395_v37 = vadd.f32 %v386_v26, %v326_v22  ;;  %v362_v15 = vmax.f32 %v360_v41, %v361_v53 }
 0x2e2   :  { %v454_v31 = vpop.permute.xlu1 %453  ;;  %v366_v39 = vsel %vm356_vm6, %v353_v28, -inf }
 0x2e3   :  { %v352_v35 = vsel %vm344_vm5, %v340_v29, 0.0  ;;  %v462_v44 = vadd.f32 %v454_v31, %v396_v36 }
 0x2e4   :  { %v452_v40 = vpop.permute.xlu0 %451  ;;  %v365_v42 = vsel %vm354_vm7, %v352_v35, -inf }
 0x2e5   :  { %v461_v45 = vadd.f32 %v452_v40, %v395_v37  ;;  %v367_v46 = vmax.f32 %v365_v42, %v366_v39 }
 0x2e6   :  { %v464_v47 = vpop.permute.xlu1 %463 }
 0x2e7   :  { %v466_v48 = vadd.f32 %v464_v47, %v459_v43  ;;  %v467_v49 = vadd.f32 %v464_v47, %v460_v38  ;;  %v468_v50 = vadd.f32 %v464_v47, %v461_v45  ;;  %v469_v51 = vadd.f32 %v464_v47, %v462_v44 }
 0x2e8   :  { %v398_v52 = vpop.permute.xlu0 %397  ;;  %v368_v54 = vrot.slane %v367_v46, 4 }
 0x2e9   :  { %v470_v55 = vmax.f32 %v466_v48, 0.0  ;;  %v471_v56 = vmax.f32 %v467_v49, 0.0  ;;  %v472_v57 = vmax.f32 %v468_v50, 0.0  ;;  %v473_v58 = vmax.f32 %v469_v51, 0.0 }
 0x2ea   :  { %v400_v59 = vadd.f32 %v398_v52, %v393_v34  ;;  %v401_v60 = vadd.f32 %v398_v52, %v394_v30  ;;  %v402_v61 = vadd.f32 %v398_v52, %v395_v37  ;;  %v403_v0 = vadd.f32 %v398_v52, %v396_v36 }
 0x2eb   :  { %v482_v1 = vsel %vm476_vm10, %v470_v55, 0.0  ;;  %v483_v2 = vsel %vm477_vm11, %v471_v56, 0.0  ;;  %v484_v3 = vsel %vm476_vm10, %v472_v57, 0.0  ;;  %v485_v4 = vsel %vm477_vm11, %v473_v58, 0.0 }
 0x2ec   :  { %v487_v5 = vsel %vm486_vm8, %v482_v1, -inf  ;;  %v489_v6 = vsel %vm488_vm9, %v483_v2, -inf  ;;  %v497_v7 = vsel %vm486_vm8, %v484_v3, -inf  ;;  %v498_v8 = vsel %vm488_vm9, %v485_v4, -inf }
 0x2ed   :  { %v490_v9 = vmax.f32 %v487_v5, %v489_v6  ;;  %v499_v10 = vmax.f32 %v497_v7, %v498_v8  ;;  %v404_v11 = vmax.f32 %v400_v59, 0.0  ;;  %v405_v12 = vmax.f32 %v401_v60, 0.0 }
 0x2ee   :  { %v406_v13 = vmax.f32 %v402_v61, 0.0  ;;  %v407_v14 = vmax.f32 %v403_v0, 0.0  ;;  %v369_v16 = vmax.f32 %v367_v46, %v368_v54  ;;  %v363_v36 = vrot.slane %v362_v15, 1 }
 0x2ef   :  { %v416_v17 = vsel %vm410_vm12, %v404_v11, 0.0  ;;  %v417_v18 = vsel %vm411_vm13, %v405_v12, 0.0  ;;  %v491_v19 = vrot.slane %v490_v9, 4  ;;  %v500_v20 = vrot.slane %v499_v10, 4 }
 0x2f0   :  { %v418_v21 = vsel %vm410_vm12, %v406_v13, 0.0  ;;  %v419_v22 = vsel %vm411_vm13, %v407_v14, 0.0  ;;  %v421_v23 = vsel %vm420_vm14, %v416_v17, -inf  ;;  %v423_v24 = vsel %vm422_vm15, %v417_v18, -inf }
 0x2f1   :  { %v424_v25 = vmax.f32 %v421_v23, %v423_v24  ;;  %v431_v26 = vsel %vm420_vm14, %v418_v21, -inf  ;;  %v432_v27 = vsel %vm422_vm15, %v419_v22, -inf  ;;  %v492_v28 = vmax.f32 %v490_v9, %v491_v19 }
 0x2f2   :  { %v433_v29 = vmax.f32 %v431_v26, %v432_v27  ;;  %v501_v30 = vmax.f32 %v499_v10, %v500_v20  ;;  %v370_v31 = vrot.slane %v369_v16, 2  ;;  %v364_v45 = vmax.f32 %v362_v15, %v363_v36 }
 0x2f3   :  { %v493_v32 = vrot.slane %v492_v28, 2  ;;  %v425_v34 = vrot.slane %v424_v25, 4 }
 0x2f4   :  { %v502_v62 = vrot.slane %v501_v30, 2  ;;  %v434_v35 = vrot.slane %v433_v29, 4  ;;  %v371_v63 = vmax.f32 %v369_v16, %v370_v31 }
 0x2f5   :  { %v494_v33 = vmax.f32 %v492_v28, %v493_v32  ;;  %v426_v37 = vmax.f32 %v424_v25, %v425_v34 }
 0x2f6   :  { %v503_v38 = vmax.f32 %v501_v30, %v502_v62  ;;  %v435_v39 = vmax.f32 %v433_v29, %v434_v35  ;;  %v372_v40 = vrot.slane %v371_v63, 1 }
 0x2f7   :  { %v495_v41 = vrot.slane %v494_v33, 1  ;;  %v427_v42 = vrot.slane %v426_v37, 2 }
 0x2f8   :  { %v504_v43 = vrot.slane %v503_v38, 1  ;;  %v436_v44 = vrot.slane %v435_v39, 2  ;;  %v373_v46 = vmax.f32 %v371_v63, %v372_v40 }
 0x2f9   :  { %v496_v47 = vmax.f32 %v494_v33, %v495_v41  ;;  %v428_v48 = vmax.f32 %v426_v37, %v427_v42 }
 0x2fa   :  { %v505_v49 = vmax.f32 %v503_v38, %v504_v43  ;;  %v437_v50 = vmax.f32 %v435_v39, %v436_v44  ;;  %v509_v51 = vsel %vm508_vm0, %v373_v46, %v364_v45 }
 0x2fb   :  { %v429_v52 = vrot.slane %v428_v48, 1 }
 0x2fc   :  { %v519_v53 = vsel %vm508_vm0, %v505_v49, %v496_v47  ;;  %v438_v54 = vrot.slane %v437_v50, 1 }
 0x2fd   :  { %520 = vrot.lane.b32.xlu1 %v519_v53, %s709_s20  ;;  %v430_v55 = vmax.f32 %v428_v48, %v429_v52 }
 0x2fe   :  { %v439_v56 = vmax.f32 %v437_v50, %v438_v54 }
 0x300   :  { %v513_v57 = vsel %vm508_vm0, %v439_v56, %v430_v55 }
 0x301   :  { %514 = vrot.lane.b32.xlu0 %v513_v57, %s707_s1 }
 0x36f   :  { %v521_v59 = vpop.permute.xlu1 %520 }
 0x373   :  { %v515_v58 = vpop.permute.xlu0 %514 }
 0x374   :  { %v523_v60 = vsel %vm354_vm7, %v509_v51, %v515_v58 }
 0x375   :  { %v525_v61 = vsel %vm524_vm1, %v523_v60, %v521_v59 }
 0x376   :  { %v527_v0 = vsel %vm526_vm2, %v525_v61, 0.0 }
 0x377   :  { %528 = vst [vmem:[#allocation9] sm:$0x3] %v527_v0 }
 0x378   :  { %685 = shalt.err (!%p682_p6)
}
 0x379   :  { %s686_s10 = scalar_lea.hbm %s912_s7, 32 }
 0x37a   :  { %p687_p7 = scmp.ne.s32.totalorder %s912_s7, %s686_s10  ;;  %p690_p8 = scmp.lt.u32.totalorder %s686_s10, %s912_s7 }
 0x37c   :  { %p692_p9 = pnand %p690_p8, %p687_p7 }
 0x37e   :  { %695 = shalt.err (!%p692_p9)
}
 0x37f   :  { %538 = dma.vmem_to_hbm [thread:$0]  %s536_s30, 32, %s912_s7, [#allocation6]  }
 0x380   :  { %700 = dma.done.wait [#allocation6], 32  }
 0x381   :  { %701 = vsyncadd [#allocation6], 4294967264 }
 0x382   :  { %542 = vsyncpa [#allocation5], 1 }
 0x383   :  { %543 = vsyncpa [#allocation8], 1 }
 0x384   :  { %544 = vsyncpa [#allocation6], 1 }

</bundles_post_ra>
